<compile_context>
chip_gen: v7x
topology: tpu7x:2x2x1
jax: 0.10.0
libtpu: 0.0.40
codegen_flags: <defaults>
</compile_context>

<pallas_src>
import functools

import jax
import jax.numpy as jnp
from jax.experimental import pallas as pl
from jax.experimental.pallas import tpu as pltpu


def _gated_adapter_kernel(x_ref, wd_ref, bd_ref, wu_ref, bu_ref, o_ref,
                          *, eps, gate_dtype):
    # One (TN, D) row-tile per grid step. LN statistics in f32.
    xf = x_ref[...].astype(jnp.float32)                       # (TN, D)
    mean = jnp.mean(xf, axis=-1, keepdims=True)               # (TN, 1)
    xc = xf - mean
    var = jnp.mean(xc * xc, axis=-1, keepdims=True)
    xn = xc * jax.lax.rsqrt(var + eps)                        # affine folded into wd/bd

    # down_proj + ReLU. Weights already in the matmul dtype (bf16 or f32); only the
    # activation is cast, accumulation stays f32 on the MXU.
    h = jnp.dot(xn.astype(wd_ref.dtype), wd_ref[...],
                preferred_element_type=jnp.float32) + bd_ref[...]
    h = jnp.maximum(h, 0.0)

    # up_proj
    u = jnp.dot(h.astype(wu_ref.dtype), wu_ref[...],
                preferred_element_type=jnp.float32) + bu_ref[...]

    # sigmoid(u) = 0.5 * (tanh(0.5*u) + 1): one EUP op instead of exp + divide.
    gate = jnp.tanh(u.astype(gate_dtype) * gate_dtype(0.5)) * gate_dtype(0.5) + gate_dtype(0.5)

    # Re-read the residual here (keeps the f32 residual out of the live set across
    # both matmuls) and store: residual + sigmoid(up_proj(...)).
    o_ref[...] = (x_ref[...].astype(jnp.float32)
                  + gate.astype(jnp.float32)).astype(o_ref.dtype)


def gated_adapter(x, gamma, beta, w_down, b_down, w_up, b_up,
                  *, eps=1e-5, block_rows=1024):
    """Fused GatedAdapter forward.

    x:          (..., D)  any float dtype
    gamma/beta: (D,)      LayerNorm affine params
    w_down:     (B, D), b_down: (B,)   (PyTorch Linear layout, out x in)
    w_up:       (D, B), b_up:   (D,)
    """
    orig_shape = x.shape
    d = orig_shape[-1]
    bneck = w_down.shape[0]

    x2 = x.reshape(-1, d)
    n = x2.shape[0]

    # ---- dtype policy -------------------------------------------------------
    # bf16 callers get the native bf16 MXU path; anything else stays exact f32.
    # (Keeping weights in their matmul dtype once, in the wrapper: no per-step cast.)
    if x.dtype == jnp.bfloat16:
        w_dtype = jnp.bfloat16
        gate_dtype = jnp.bfloat16
    else:
        w_dtype = jnp.float32
        gate_dtype = jnp.float32

    # ---- parameter prep (one-time, tiny vs streaming x) ---------------------
    # Fold LayerNorm affine into down_proj:
    #   LN(x) @ Wd^T + bd = (xc*inv) @ (gamma[:,None] * Wd^T) + (beta @ Wd^T + bd)
    wd_f32 = jnp.transpose(w_down).astype(jnp.float32)        # (D, B)
    wd_fold = wd_f32 * gamma.astype(jnp.float32)[:, None]     # (D, B)
    bd_fold = beta.astype(jnp.float32) @ wd_f32 + b_down.astype(jnp.float32)  # (B,)
    wu_f32 = jnp.transpose(w_up).astype(jnp.float32)          # (B, D)

    # Pad the bottleneck dim to a lane multiple so both matmuls see full MXU tiles.
    bneck_pad = ((bneck + 127) // 128) * 128
    if bneck_pad != bneck:
        pad = bneck_pad - bneck
        wd_fold = jnp.pad(wd_fold, ((0, 0), (0, pad)))        # zero cols -> h extra = relu(0)=0
        bd_fold = jnp.pad(bd_fold, (0, pad))
        wu_f32 = jnp.pad(wu_f32, ((0, pad), (0, 0)))          # zero rows -> no contribution

    wd = wd_fold.astype(w_dtype)                               # (D, Bp) resident
    wu = wu_f32.astype(w_dtype)                                # (Bp, D) resident
    bd = bd_fold.reshape(1, bneck_pad).astype(jnp.float32)
    bu = b_up.reshape(1, d).astype(jnp.float32)

    x_itemsize = jnp.dtype(x.dtype).itemsize
    w_itemsize = jnp.dtype(w_dtype).itemsize

    # ---- generation-aware VMEM budget & row-tile selection ------------------
    try:
        vmem_cap = int(pltpu.get_tpu_info().vmem_capacity_bytes)
    except Exception:
        vmem_cap = 64 << 20                                    # conservative (v7x per-TC)
    # Leave ~16 MiB of headroom for compiler-internal scratch; never ask for more
    # than 112 MiB even on 128-MiB parts.
    budget = max(min(vmem_cap - (16 << 20), 112 << 20), 16 << 20)

    weight_bytes = 2 * d * bneck_pad * w_itemsize + (d + bneck_pad + 2) * 4

    def _footprint(rows):
        io = 2 * (2 * rows * d * x_itemsize)                   # double-buffered in + out tiles
        interm = rows * (3 * d + 2 * bneck_pad) * 4            # f32 temporaries (LN, gate, h)
        return io + interm + 2 * weight_bytes                  # weights (worst case 2 copies)

    n_rounded = ((n + 7) // 8) * 8
    tn = max(8, (min(block_rows, n_rounded) // 8) * 8)
    while tn > 8 and _footprint(tn) > budget:
        tn = max(8, ((tn // 2) // 8) * 8)

    vmem_limit = int(min(budget, max(32 << 20, _footprint(tn) + (8 << 20))))

    grid = (pl.cdiv(n, tn),)                                   # ragged last block: OOB writes masked

    kernel = functools.partial(_gated_adapter_kernel, eps=eps, gate_dtype=gate_dtype)

    cost = pl.CostEstimate(
        flops=4 * n * d * bneck_pad + 12 * n * d,              # 2 matmuls + LN/elementwise
        transcendentals=n * d + n,                             # tanh gate + rsqrt
        bytes_accessed=(2 * n * d * x_itemsize                 # stream x in, out
                        + 2 * d * bneck_pad * w_itemsize       # weights (once)
                        + (d + bneck_pad) * 4),
    )

    def _build(single_buffer_weights):
        resident_kwargs = {}
        if single_buffer_weights:
            # Constant index_map blocks never swap -> a second buffer is wasted VMEM.
            resident_kwargs = dict(pipeline_mode=pl.Buffered(1))
        in_specs = [
            pl.BlockSpec((tn, d), lambda i: (i, 0)),                             # x row tile (pipelined)
            pl.BlockSpec((d, bneck_pad), lambda i: (0, 0), **resident_kwargs),   # folded W_down^T (resident)
            pl.BlockSpec((1, bneck_pad), lambda i: (0, 0), **resident_kwargs),   # folded b_down
            pl.BlockSpec((bneck_pad, d), lambda i: (0, 0), **resident_kwargs),   # W_up^T (resident)
            pl.BlockSpec((1, d), lambda i: (0, 0), **resident_kwargs),           # b_up
        ]
        return pl.pallas_call(
            kernel,
            out_shape=jax.ShapeDtypeStruct((n, d), x.dtype),
            grid_spec=pltpu.PrefetchScalarGridSpec(
                num_scalar_prefetch=0,
                grid=grid,
                in_specs=in_specs,
                out_specs=pl.BlockSpec((tn, d), lambda i: (i, 0)),               # lane-dense output tile
            ),
            compiler_params=pltpu.CompilerParams(
                dimension_semantics=("parallel",),             # rows independent -> 2-TC split on v7x
                vmem_limit_bytes=vmem_limit,
            ),
            cost_estimate=cost,
        )

    try:
        out = _build(True)(x2, wd, bd, wu, bu)
    except Exception:
        # Fallback if this runtime rejects pipeline_mode=pl.Buffered(1).
        out = _build(False)(x2, wd, bd, wu, bu)

    return out.reshape(orig_shape)


def _reference(x, gamma, beta, w_down, b_down, w_up, b_up, eps=1e-5):
    # Pure-JAX mirror of the PyTorch module.
    xf = x.astype(jnp.float32)
    mean = jnp.mean(xf, axis=-1, keepdims=True)
    var = jnp.mean((xf - mean) ** 2, axis=-1, keepdims=True)
    xn = (xf - mean) / jnp.sqrt(var + eps) * gamma + beta
    h = jnp.maximum(xn @ w_down.astype(jnp.float32).T + b_down, 0.0)
    u = h @ w_up.astype(jnp.float32).T + b_up
    return (xf + jax.nn.sigmoid(u)).astype(x.dtype)


if __name__ == "__main__":
    key = jax.random.PRNGKey(0)
    ks = jax.random.split(key, 7)

    batch, seq, input_dim, bottleneck_dim = 2, 8, 32, 32     # small shapes consistent with the module

    x = jax.random.normal(ks[0], (batch, seq, input_dim), dtype=jnp.float32)
    gamma = 1.0 + 0.1 * jax.random.normal(ks[1], (input_dim,), dtype=jnp.float32)
    beta = 0.1 * jax.random.normal(ks[2], (input_dim,), dtype=jnp.float32)
    w_down = 0.2 * jax.random.normal(ks[3], (bottleneck_dim, input_dim), dtype=jnp.float32)
    b_down = 0.1 * jax.random.normal(ks[4], (bottleneck_dim,), dtype=jnp.float32)
    w_up = 0.2 * jax.random.normal(ks[5], (input_dim, bottleneck_dim), dtype=jnp.float32)
    b_up = 0.1 * jax.random.normal(ks[6], (input_dim,), dtype=jnp.float32)

    out = gated_adapter(x, gamma, beta, w_down, b_down, w_up, b_up)
    out = jax.block_until_ready(out)

    ref = _reference(x, gamma, beta, w_down, b_down, w_up, b_up)
    assert out.shape == ref.shape, (out.shape, ref.shape)
    max_err = float(jnp.max(jnp.abs(out.astype(jnp.float32) - ref.astype(jnp.float32))))
    assert jnp.allclose(out, ref, rtol=1e-4, atol=1e-4), max_err

    print("KERNEL_OK")
</pallas_src>

<mosaic_0001>
module attributes {stable_mosaic.version = 11 : i64} {
  func.func @_gated_adapter_kernel(%arg0: i32, %arg1: memref<16x32xf32, #tpu.memory_space<vmem>>, %arg2: memref<32x128xf32, #tpu.memory_space<vmem>>, %arg3: memref<1x128xf32, #tpu.memory_space<vmem>>, %arg4: memref<128x32xf32, #tpu.memory_space<vmem>>, %arg5: memref<1x32xf32, #tpu.memory_space<vmem>>, %arg6: memref<16x32xf32, #tpu.memory_space<vmem>>) attributes {dimension_semantics = [#tpu.dimension_semantics<parallel>], iteration_bounds = array<i64: 1>, scalar_prefetch = 0 : i64, scratch_operands = 0 : i64, tpu.core_type = #tpu.core_type<tc>, window_params = [{transform_indices = @transform_0, window_bounds = array<i64: 16, 32>}, {pipeline_mode = #tpu.pipeline_mode<synchronous>, transform_indices = @transform_1, window_bounds = array<i64: 32, 128>}, {pipeline_mode = #tpu.pipeline_mode<synchronous>, transform_indices = @transform_2, window_bounds = array<i64: 1, 128>}, {pipeline_mode = #tpu.pipeline_mode<synchronous>, transform_indices = @transform_3, window_bounds = array<i64: 128, 32>}, {pipeline_mode = #tpu.pipeline_mode<synchronous>, transform_indices = @transform_4, window_bounds = array<i64: 1, 32>}, {transform_indices = @transform_5, window_bounds = array<i64: 16, 32>}]} {
    %c0 = arith.constant 0 : index
    %c0_0 = arith.constant 0 : index
    %0 = vector.load %arg1[%c0, %c0_0] : memref<16x32xf32, #tpu.memory_space<vmem>>, vector<16x32xf32>
    %cst = arith.constant dense<0.000000e+00> : vector<16xf32>
    %1 = vector.multi_reduction <add>, %0, %cst [1] : vector<16x32xf32> to vector<16xf32>
    %2 = vector.shape_cast %1 : vector<16xf32> to vector<16x1xf32>
    %cst_1 = arith.constant 3.200000e+01 : f32
    %3 = vector.broadcast %cst_1 : f32 to vector<16x1xf32>
    %4 = arith.divf %2, %3 : vector<16x1xf32>
    %5 = vector.broadcast %4 : vector<16x1xf32> to vector<16x32xf32>
    %6 = arith.subf %0, %5 : vector<16x32xf32>
    %7 = arith.mulf %6, %6 : vector<16x32xf32>
    %cst_2 = arith.constant dense<0.000000e+00> : vector<16xf32>
    %8 = vector.multi_reduction <add>, %7, %cst_2 [1] : vector<16x32xf32> to vector<16xf32>
    %9 = vector.shape_cast %8 : vector<16xf32> to vector<16x1xf32>
    %cst_3 = arith.constant 3.200000e+01 : f32
    %10 = vector.broadcast %cst_3 : f32 to vector<16x1xf32>
    %11 = arith.divf %9, %10 : vector<16x1xf32>
    %cst_4 = arith.constant 9.99999974E-6 : f32
    %12 = vector.broadcast %cst_4 : f32 to vector<16x1xf32>
    %13 = arith.addf %11, %12 : vector<16x1xf32>
    %14 = math.rsqrt %13 : vector<16x1xf32>
    %15 = vector.broadcast %14 : vector<16x1xf32> to vector<16x32xf32>
    %16 = arith.mulf %6, %15 : vector<16x32xf32>
    %c0_5 = arith.constant 0 : index
    %c0_6 = arith.constant 0 : index
    %17 = vector.load %arg2[%c0_5, %c0_6] : memref<32x128xf32, #tpu.memory_space<vmem>>, vector<32x128xf32>
    %cst_7 = arith.constant dense<0.000000e+00> : vector<16x128xf32>
    %18 = tpu.matmul %16, %17, %cst_7 {dimension_numbers = #tpu.dot_dimension_numbers<[1], [0], [0], [1], [0, 0, 1, 1], [], []>} : vector<16x32xf32>, vector<32x128xf32>, vector<16x128xf32> -> vector<16x128xf32>
    %c0_8 = arith.constant 0 : index
    %c0_9 = arith.constant 0 : index
    %19 = vector.load %arg3[%c0_8, %c0_9] : memref<1x128xf32, #tpu.memory_space<vmem>>, vector<1x128xf32>
    %20 = vector.broadcast %19 : vector<1x128xf32> to vector<16x128xf32>
    %21 = arith.addf %18, %20 : vector<16x128xf32>
    %cst_10 = arith.constant 0.000000e+00 : f32
    %22 = vector.broadcast %cst_10 : f32 to vector<16x128xf32>
    %23 = arith.maximumf %21, %22 : vector<16x128xf32>
    %c0_11 = arith.constant 0 : index
    %c0_12 = arith.constant 0 : index
    %24 = vector.load %arg4[%c0_11, %c0_12] : memref<128x32xf32, #tpu.memory_space<vmem>>, vector<128x32xf32>
    %cst_13 = arith.constant dense<0.000000e+00> : vector<16x32xf32>
    %25 = tpu.matmul %23, %24, %cst_13 {dimension_numbers = #tpu.dot_dimension_numbers<[1], [0], [0], [1], [0, 0, 1, 1], [], []>} : vector<16x128xf32>, vector<128x32xf32>, vector<16x32xf32> -> vector<16x32xf32>
    %c0_14 = arith.constant 0 : index
    %c0_15 = arith.constant 0 : index
    %26 = vector.load %arg5[%c0_14, %c0_15] : memref<1x32xf32, #tpu.memory_space<vmem>>, vector<1x32xf32>
    %27 = vector.broadcast %26 : vector<1x32xf32> to vector<16x32xf32>
    %28 = arith.addf %25, %27 : vector<16x32xf32>
    %cst_16 = arith.constant 5.000000e-01 : f32
    %29 = vector.broadcast %cst_16 : f32 to vector<16x32xf32>
    %30 = arith.mulf %28, %29 : vector<16x32xf32>
    %31 = math.tanh %30 : vector<16x32xf32>
    %cst_17 = arith.constant 5.000000e-01 : f32
    %32 = vector.broadcast %cst_17 : f32 to vector<16x32xf32>
    %33 = arith.mulf %31, %32 : vector<16x32xf32>
    %cst_18 = arith.constant 5.000000e-01 : f32
    %34 = vector.broadcast %cst_18 : f32 to vector<16x32xf32>
    %35 = arith.addf %33, %34 : vector<16x32xf32>
    %c0_19 = arith.constant 0 : index
    %c0_20 = arith.constant 0 : index
    %36 = vector.load %arg1[%c0_19, %c0_20] : memref<16x32xf32, #tpu.memory_space<vmem>>, vector<16x32xf32>
    %37 = arith.addf %36, %35 : vector<16x32xf32>
    %c0_21 = arith.constant 0 : index
    %c0_22 = arith.constant 0 : index
    %38 = vector.load %arg6[%c0_21, %c0_22] : memref<16x32xf32, #tpu.memory_space<vmem>>, vector<16x32xf32>
    tpu.vector_store %arg6[%c0_21, %c0_22], %37 {strides = array<i32>} : memref<16x32xf32, #tpu.memory_space<vmem>>, vector<16x32xf32>,
    return
  }
  func.func @transform_0(%arg0: i32) -> (i32, i32) {
    %c0_i32 = arith.constant 0 : i32
    %c0_i32_0 = arith.constant 0 : i32
    return %arg0, %c0_i32 : i32, i32
  }
  func.func @transform_1(%arg0: i32) -> (i32, i32) {
    %c0_i32 = arith.constant 0 : i32
    %c0_i32_0 = arith.constant 0 : i32
    %c0_i32_1 = arith.constant 0 : i32
    return %c0_i32, %c0_i32_0 : i32, i32
  }
  func.func @transform_2(%arg0: i32) -> (i32, i32) {
    %c0_i32 = arith.constant 0 : i32
    %c0_i32_0 = arith.constant 0 : i32
    %c0_i32_1 = arith.constant 0 : i32
    return %c0_i32, %c0_i32_0 : i32, i32
  }
  func.func @transform_3(%arg0: i32) -> (i32, i32) {
    %c0_i32 = arith.constant 0 : i32
    %c0_i32_0 = arith.constant 0 : i32
    %c0_i32_1 = arith.constant 0 : i32
    return %c0_i32, %c0_i32_0 : i32, i32
  }
  func.func @transform_4(%arg0: i32) -> (i32, i32) {
    %c0_i32 = arith.constant 0 : i32
    %c0_i32_0 = arith.constant 0 : i32
    %c0_i32_1 = arith.constant 0 : i32
    return %c0_i32, %c0_i32_0 : i32, i32
  }
  func.func @transform_5(%arg0: i32) -> (i32, i32) {
    %c0_i32 = arith.constant 0 : i32
    %c0_i32_0 = arith.constant 0 : i32
    return %arg0, %c0_i32 : i32, i32
  }
}

module attributes {stable_mosaic.version = 11 : i64} {
  func.func @_gated_adapter_kernel(%arg0: i32, %arg1: memref<16x32xf32, #tpu.memory_space<vmem>>, %arg2: memref<32x128xf32, #tpu.memory_space<vmem>>, %arg3: memref<1x128xf32, #tpu.memory_space<vmem>>, %arg4: memref<128x32xf32, #tpu.memory_space<vmem>>, %arg5: memref<1x32xf32, #tpu.memory_space<vmem>>, %arg6: memref<16x32xf32, #tpu.memory_space<vmem>>) attributes {dimension_semantics = [#tpu.dimension_semantics<parallel>], iteration_bounds = array<i64: 1>, scalar_prefetch = 0 : i64, scratch_operands = 0 : i64, tpu.core_type = #tpu.core_type<tc>, window_params = [{transform_indices = @transform_0, window_bounds = array<i64: 16, 32>}, {pipeline_mode = #tpu.pipeline_mode<synchronous>, transform_indices = @transform_1, window_bounds = array<i64: 32, 128>}, {pipeline_mode = #tpu.pipeline_mode<synchronous>, transform_indices = @transform_2, window_bounds = array<i64: 1, 128>}, {pipeline_mode = #tpu.pipeline_mode<synchronous>, transform_indices = @transform_3, window_bounds = array<i64: 128, 32>}, {pipeline_mode = #tpu.pipeline_mode<synchronous>, transform_indices = @transform_4, window_bounds = array<i64: 1, 32>}, {transform_indices = @transform_5, window_bounds = array<i64: 16, 32>}]} {
    %c0 = arith.constant 0 : index
    %c0_0 = arith.constant 0 : index
    %0 = vector.load %arg1[%c0, %c0_0] : memref<16x32xf32, #tpu.memory_space<vmem>>, vector<16x32xf32>
    %cst = arith.constant dense<0.000000e+00> : vector<16xf32>
    %1 = vector.multi_reduction <add>, %0, %cst [1] : vector<16x32xf32> to vector<16xf32>
    %2 = vector.shape_cast %1 : vector<16xf32> to vector<16x1xf32>
    %cst_1 = arith.constant 3.200000e+01 : f32
    %3 = vector.broadcast %cst_1 : f32 to vector<16x1xf32>
    %4 = arith.divf %2, %3 : vector<16x1xf32>
    %5 = vector.broadcast %4 : vector<16x1xf32> to vector<16x32xf32>
    %6 = arith.subf %0, %5 : vector<16x32xf32>
    %7 = arith.mulf %6, %6 : vector<16x32xf32>
    %cst_2 = arith.constant dense<0.000000e+00> : vector<16xf32>
    %8 = vector.multi_reduction <add>, %7, %cst_2 [1] : vector<16x32xf32> to vector<16xf32>
    %9 = vector.shape_cast %8 : vector<16xf32> to vector<16x1xf32>
    %cst_3 = arith.constant 3.200000e+01 : f32
    %10 = vector.broadcast %cst_3 : f32 to vector<16x1xf32>
    %11 = arith.divf %9, %10 : vector<16x1xf32>
    %cst_4 = arith.constant 9.99999974E-6 : f32
    %12 = vector.broadcast %cst_4 : f32 to vector<16x1xf32>
    %13 = arith.addf %11, %12 : vector<16x1xf32>
    %14 = math.rsqrt %13 : vector<16x1xf32>
    %15 = vector.broadcast %14 : vector<16x1xf32> to vector<16x32xf32>
    %16 = arith.mulf %6, %15 : vector<16x32xf32>
    %c0_5 = arith.constant 0 : index
    %c0_6 = arith.constant 0 : index
    %17 = vector.load %arg2[%c0_5, %c0_6] : memref<32x128xf32, #tpu.memory_space<vmem>>, vector<32x128xf32>
    %cst_7 = arith.constant dense<0.000000e+00> : vector<16x128xf32>
    %18 = tpu.matmul %16, %17, %cst_7 {dimension_numbers = #tpu.dot_dimension_numbers<[1], [0], [0], [1], [0, 0, 1, 1], [], []>} : vector<16x32xf32>, vector<32x128xf32>, vector<16x128xf32> -> vector<16x128xf32>
    %c0_8 = arith.constant 0 : index
    %c0_9 = arith.constant 0 : index
    %19 = vector.load %arg3[%c0_8, %c0_9] : memref<1x128xf32, #tpu.memory_space<vmem>>, vector<1x128xf32>
    %20 = vector.broadcast %19 : vector<1x128xf32> to vector<16x128xf32>
    %21 = arith.addf %18, %20 : vector<16x128xf32>
    %cst_10 = arith.constant 0.000000e+00 : f32
    %22 = vector.broadcast %cst_10 : f32 to vector<16x128xf32>
    %23 = arith.maximumf %21, %22 : vector<16x128xf32>
    %c0_11 = arith.constant 0 : index
    %c0_12 = arith.constant 0 : index
    %24 = vector.load %arg4[%c0_11, %c0_12] : memref<128x32xf32, #tpu.memory_space<vmem>>, vector<128x32xf32>
    %cst_13 = arith.constant dense<0.000000e+00> : vector<16x32xf32>
    %25 = tpu.matmul %23, %24, %cst_13 {dimension_numbers = #tpu.dot_dimension_numbers<[1], [0], [0], [1], [0, 0, 1, 1], [], []>} : vector<16x128xf32>, vector<128x32xf32>, vector<16x32xf32> -> vector<16x32xf32>
    %c0_14 = arith.constant 0 : index
    %c0_15 = arith.constant 0 : index
    %26 = vector.load %arg5[%c0_14, %c0_15] : memref<1x32xf32, #tpu.memory_space<vmem>>, vector<1x32xf32>
    %27 = vector.broadcast %26 : vector<1x32xf32> to vector<16x32xf32>
    %28 = arith.addf %25, %27 : vector<16x32xf32>
    %cst_16 = arith.constant 5.000000e-01 : f32
    %29 = vector.broadcast %cst_16 : f32 to vector<16x32xf32>
    %30 = arith.mulf %28, %29 : vector<16x32xf32>
    %31 = math.tanh %30 : vector<16x32xf32>
    %cst_17 = arith.constant 5.000000e-01 : f32
    %32 = vector.broadcast %cst_17 : f32 to vector<16x32xf32>
    %33 = arith.mulf %31, %32 : vector<16x32xf32>
    %cst_18 = arith.constant 5.000000e-01 : f32
    %34 = vector.broadcast %cst_18 : f32 to vector<16x32xf32>
    %35 = arith.addf %33, %34 : vector<16x32xf32>
    %c0_19 = arith.constant 0 : index
    %c0_20 = arith.constant 0 : index
    %36 = vector.load %arg1[%c0_19, %c0_20] : memref<16x32xf32, #tpu.memory_space<vmem>>, vector<16x32xf32>
    %37 = arith.addf %36, %35 : vector<16x32xf32>
    %c0_21 = arith.constant 0 : index
    %c0_22 = arith.constant 0 : index
    %38 = vector.load %arg6[%c0_21, %c0_22] : memref<16x32xf32, #tpu.memory_space<vmem>>, vector<16x32xf32>
    tpu.vector_store %arg6[%c0_21, %c0_22], %37 {strides = array<i32>} : memref<16x32xf32, #tpu.memory_space<vmem>>, vector<16x32xf32>,
    return
  }
  func.func @transform_0(%arg0: i32) -> (i32, i32) {
    %c0_i32 = arith.constant 0 : i32
    %c0_i32_0 = arith.constant 0 : i32
    return %arg0, %c0_i32 : i32, i32
  }
  func.func @transform_1(%arg0: i32) -> (i32, i32) {
    %c0_i32 = arith.constant 0 : i32
    %c0_i32_0 = arith.constant 0 : i32
    %c0_i32_1 = arith.constant 0 : i32
    return %c0_i32, %c0_i32_0 : i32, i32
  }
  func.func @transform_2(%arg0: i32) -> (i32, i32) {
    %c0_i32 = arith.constant 0 : i32
    %c0_i32_0 = arith.constant 0 : i32
    %c0_i32_1 = arith.constant 0 : i32
    return %c0_i32, %c0_i32_0 : i32, i32
  }
  func.func @transform_3(%arg0: i32) -> (i32, i32) {
    %c0_i32 = arith.constant 0 : i32
    %c0_i32_0 = arith.constant 0 : i32
    %c0_i32_1 = arith.constant 0 : i32
    return %c0_i32, %c0_i32_0 : i32, i32
  }
  func.func @transform_4(%arg0: i32) -> (i32, i32) {
    %c0_i32 = arith.constant 0 : i32
    %c0_i32_0 = arith.constant 0 : i32
    %c0_i32_1 = arith.constant 0 : i32
    return %c0_i32, %c0_i32_0 : i32, i32
  }
  func.func @transform_5(%arg0: i32) -> (i32, i32) {
    %c0_i32 = arith.constant 0 : i32
    %c0_i32_0 = arith.constant 0 : i32
    return %arg0, %c0_i32 : i32, i32
  }
}

</mosaic_0001>

<bundles_post_ra>
// kernel: tpu_custom_call.1
= control target key start
LH: loop header
LB: loop body
LE: loop exit
PB: predicated region body
PF: predicated region fallthrough
CT: control target
= control target key end

     0   :  { %vm23_vm0 = vcmask 261120   ;;  %s565_s0 = inlined_call_operand.vmem [shape: f32[16,32], index: 0, kind: input, shape index: {}]   ;;  %s566_s1 = inlined_call_operand.vmem [shape: f32[32,128], index: 1, kind: input, shape index: {}]   ;;  %s567_s2 = inlined_call_operand.vmem [shape: f32[1,128], index: 2, kind: input, shape index: {}]   ;;  %s568_s3 = inlined_call_operand.vmem [shape: f32[128,32], index: 3, kind: input, shape index: {}]   ;;  %s569_s4 = inlined_call_operand.vmem [shape: f32[1,32], index: 4, kind: input, shape index: {}]   ;;  %s570_s5 = inlined_call_operand.hbm [shape: f32[16,32], index: 5, kind: output, shape index: {}]  }
   0x1   :  { %v456_v0 = vld [vmem:[%s565_s0] sm:$0xff]  ;;  %v461_v1 = vld [vmem:[%s565_s0 + $0x8] sm:$0xff] }
   0x2   :  { %10 = vsyncpa [#allocation3], 0  ;;  %v24_v2 = vsel %vm23_vm0, %v456_v0, 0.0  ;;  %v27_v3 = vsel %vm23_vm0, %v461_v1, 0.0  ;;  %v51_v14 = vld [vmem:[%s566_s1] sm:$0xff]  ;;  %v52_v15 = vld [vmem:[%s566_s1 + $0x8] sm:$0xff] }
   0x3   :  { %25 = vadd.xlane.f32.xlu0 %v24_v2  ;;  %v53_v16 = vld [vmem:[%s566_s1 + $0x10] sm:$0xff]  ;;  %v345_v17 = vpack.c.bf16 %v52_v15, %v51_v14  ;;  %v54_v18 = vld [vmem:[%s566_s1 + $0x18] sm:$0xff]  ;;  %v145_v20 = vld [vmem:[%s568_s3] sm:$0xff] }
   0x4   :  { %v349_v19 = vpack.c.bf16 %v54_v18, %v53_v16  ;;  %v146_v21 = vld [vmem:[%s568_s3 + $0x8] sm:$0xff]  ;;  %v147_v22 = vld [vmem:[%s568_s3 + $0x10] sm:$0xff]  ;;  %v148_v24 = vld [vmem:[%s568_s3 + $0x18] sm:$0xff] }
   0x5   :  { %346 = vmatprep.subr.bf16.mxu0 %v345_v17  ;;  %v353_v23 = vpack.c.bf16 %v146_v21, %v145_v20  ;;  %v357_v25 = vpack.c.bf16 %v148_v24, %v147_v22  ;;  %v149_v26 = vld [vmem:[%s568_s3 + $0x20] sm:$0xff]  ;;  %v150_v27 = vld [vmem:[%s568_s3 + $0x28] sm:$0xff]  ;;  %v151_v29 = vld [vmem:[%s568_s3 + $0x30] sm:$0xff] }
   0x6   :  { %348 = vmatpush3.bf16.msra.mxu0 %v345_v17  ;;  %v361_v28 = vpack.c.bf16 %v150_v27, %v149_v26  ;;  %v152_v30 = vld [vmem:[%s568_s3 + $0x38] sm:$0xff]  ;;  %v153_v32 = vld [vmem:[%s568_s3 + $0x40] sm:$0xff]  ;;  %v154_v33 = vld [vmem:[%s568_s3 + $0x48] sm:$0xff] }
   0x7   :  { %28 = vadd.xlane.f32.xlu0 %v27_v3  ;;  %350 = vmatprep.subr.bf16.mxu0 %v349_v19  ;;  %v365_v31 = vpack.c.bf16 %v152_v30, %v151_v29  ;;  %v369_v34 = vpack.c.bf16 %v154_v33, %v153_v32  ;;  %v155_v35 = vld [vmem:[%s568_s3 + $0x50] sm:$0xff]  ;;  %v156_v36 = vld [vmem:[%s568_s3 + $0x58] sm:$0xff]  ;;  %v157_v38 = vld [vmem:[%s568_s3 + $0x60] sm:$0xff] }
   0x8   :  { %354 = vmatprep.subr.bf16.mxu1 %v353_v23  ;;  %v373_v37 = vpack.c.bf16 %v156_v36, %v155_v35  ;;  %v158_v39 = vld [vmem:[%s568_s3 + $0x68] sm:$0xff]  ;;  %v159_v51 = vld [vmem:[%s568_s3 + $0x70] sm:$0xff]  ;;  %v160_v52 = vld [vmem:[%s568_s3 + $0x78] sm:$0xff] }
   0x9   :  { %356 = vmatpush3.bf16.msra.mxu1 %v353_v23  ;;  %v377_v40 = vpack.c.bf16 %v158_v39, %v157_v38  ;;  %v381_v53 = vpack.c.bf16 %v160_v52, %v159_v51  ;;  %v271_v54 = vld [vmem:[%s567_s2] ss:$0 sm:$0xff]  ;;  %s420_s2 = smov [#allocation2]  }
   0xa   :  { %352 = vmatpush3.bf16.msra.mxu0 %v349_v19  ;;  %358 = vmatprep.subr.bf16.mxu1 %v357_v25  ;;  %v274_v61 = vld [vmem:[%s569_s4] ss:$0 sm:$0xff]  ;;  %s260_s3 = sshll.u32 %s420_s2, 4  ;;  %s261_s3 = int_to_ptr.vmem [resolvable:$true] %s260_s3 }
   0xb   :  { %s396_s4 = scalar_lea.vmem %s261_s3, 256  ;;  %p401_p1 = scmp.lt.s32.totalorder %s261_s3, %s261_s3 }
   0xc   :  { %p397_p0 = scmp.ne.s32.totalorder %s261_s3, %s396_s4  ;;  %p402_p2 = scmp.lt.s32.totalorder %s396_s4, %s396_s4 }
   0xd   :  { %360 = vmatpush3.bf16.msra.mxu1 %v357_v25 }
   0xe   :  { %362 = vmatprep.subr.bf16.mxu1 %v361_v28  ;;  %p403_p3 = por %p402_p2, %p401_p1 }
  0x10   :  { %p404_p4 = pnand %p403_p3, %p397_p0 }
  0x11   :  { %364 = vmatpush3.bf16.msra.mxu1 %v361_v28 }
  0x12   :  { %366 = vmatprep.subr.bf16.mxu1 %v365_v31 }
  0x15   :  { %368 = vmatpush3.bf16.msra.mxu1 %v365_v31 }
  0x16   :  { %370 = vmatprep.subr.bf16.mxu1 %v369_v34 }
  0x19   :  { %372 = vmatpush3.bf16.msra.mxu1 %v369_v34 }
  0x1a   :  { %374 = vmatprep.subr.bf16.mxu1 %v373_v37 }
  0x1d   :  { %376 = vmatpush3.bf16.msra.mxu1 %v373_v37 }
  0x1e   :  { %378 = vmatprep.subr.bf16.mxu1 %v377_v40 }
  0x21   :  { %380 = vmatpush3.bf16.msra.mxu1 %v377_v40 }
  0x22   :  { %382 = vmatprep.subr.bf16.mxu1 %v381_v53 }
  0x25   :  { %384 = vmatpush3.bf16.msra.mxu1 %v381_v53 }
  0x90   :  { %v26_v4 = vpop.xlane.xlu0 %25 }
  0x91   :  { %v31_v5 = vmul.f32 0.03125, %v26_v4 }
  0x93   :  { %v468_v6 = vsub.f32 %v456_v0, %v31_v5 }
  0x94   :  { %v29_v7 = vpop.xlane.xlu0 %28 }
  0x95   :  { %v32_v8 = vmul.f32 0.03125, %v29_v7  ;;  %v35_v9 = vmul.f32 %v468_v6, %v468_v6 }
  0x97   :  { %v473_v10 = vsub.f32 %v461_v1, %v32_v8  ;;  %v37_v11 = vsel %vm23_vm0, %v35_v9, 0.0 }
  0x98   :  { %38 = vadd.xlane.f32.xlu1 %v37_v11 }
  0x99   :  { %v36_v12 = vmul.f32 %v473_v10, %v473_v10 }
  0x9b   :  { %v40_v13 = vsel %vm23_vm0, %v36_v12, 0.0 }
  0x9c   :  { %41 = vadd.xlane.f32.xlu1 %v40_v13 }
 0x125   :  { %v39_v41 = vpop.xlane.xlu1 %38 }
 0x126   :  { %v43_v42 = vmul.f32 0.03125, %v39_v41 }
 0x128   :  { %v45_v43 = vadd.f32 1e-05, %v43_v42 }
 0x129   :  { %v42_v44 = vpop.xlane.xlu1 %41 }
 0x12a   :  { %388 = vrsqrt.f32 %v45_v43  ;;  %v44_v45 = vmul.f32 0.03125, %v42_v44 }
 0x12c   :  { %v46_v46 = vadd.f32 1e-05, %v44_v45 }
 0x12e   :  { %390 = vrsqrt.f32 %v46_v46 }
 0x134   :  { %v389_v47 = vpop.eup %388 }
 0x135   :  { %v49_v48 = vmul.f32 %v389_v47, %v468_v6 }
 0x137   :  { %307 = vmatprep.mubr.msk.f32.mxu0 %vm23_vm0, %v49_v48 }
 0x138   :  { %v391_v49 = vpop.eup %390 }
 0x139   :  { %v50_v50 = vmul.f32 %v391_v49, %v473_v10 }
 0x13b   :  { %308 = vmatmul.mubr.msk.f32.vlgmr.msra.gmra.mrb[0].mxu0 %vm23_vm0, %v50_v50 }
 0x20e   :  { %v309_v55 = vpop.f32.mrb[0].mxu0 }
 0x20f   :  { %v140_v56 = vadd.f32 %v309_v55, %v271_v54  ;;  %v134_v57 = vpop.f32.mrb[1].mxu0 }
 0x210   :  { %v135_v58 = vadd.f32 %v271_v54, %v134_v57 }
 0x211   :  { %v144_v60 = vmax.f32 %v140_v56, 0.0 }
 0x212   :  { %v143_v59 = vmax.f32 %v135_v58, 0.0 }
 0x214   :  { %342 = vmatprep.mubr.f32.mxu1 %v143_v59 }
 0x215   :  { %343 = vmatmul.mubr.f32.vlgmr.msra.gmra.mrb[0].mxu1 %v144_v60 }
 0x2e8   :  { %v344_v62 = vpop.f32.mrb[0].mxu1 }
 0x2e9   :  { %v240_v63 = vadd.f32 %v344_v62, %v274_v61  ;;  %v234_v2 = vpop.f32.mrb[1].mxu1 }
 0x2ea   :  { %v235_v3 = vadd.f32 %v274_v61, %v234_v2 }
 0x2eb   :  { %v244_v4 = vmul.f32 0.5, %v240_v63 }
 0x2ec   :  { %v243_v5 = vmul.f32 0.5, %v235_v3 }
 0x2ed   :  { %392 = vtanh.f32 %v244_v4 }
 0x2ee   :  { %394 = vtanh.f32 %v243_v5 }
 0x2f7   :  { %v393_v6 = vpop.eup %392 }
 0x2f8   :  { %v395_v7 = vpop.eup %394  ;;  %v248_v8 = vmul.f32 0.5, %v393_v6 }
 0x2f9   :  { %v247_v9 = vmul.f32 0.5, %v395_v7 }
 0x2fa   :  { %v250_v10 = vadd.f32 0.5, %v248_v8 }
 0x2fb   :  { %v249_v11 = vadd.f32 0.5, %v247_v9 }
 0x2fc   :  { %v252_v12 = vadd.f32 %v250_v10, %v461_v1 }
 0x2fd   :  { %v251_v13 = vadd.f32 %v249_v11, %v456_v0 }
 0x2fe   :  { %254 = vst.msk [vmem:[#allocation2 + $0x8] sm:$0xff] %vm23_vm0, %v252_v12 }
 0x2ff   :  { %253 = vst.msk [vmem:[#allocation2] sm:$0xff] %vm23_vm0, %v251_v13 }
 0x300   :  { %407 = shalt.err (!%p404_p4)
}
 0x301   :  { %s408_s14 = scalar_lea.hbm %s570_s5, 256 }
 0x302   :  { %p409_p5 = scmp.ne.s32.totalorder %s570_s5, %s408_s14  ;;  %p412_p6 = scmp.lt.u32.totalorder %s408_s14, %s570_s5 }
 0x304   :  { %p414_p7 = pnand %p412_p6, %p409_p5 }
 0x306   :  { %417 = shalt.err (!%p414_p7)
}
 0x307   :  { %s421_s19 = smov 128   ;;  %s422_s20 = smov 8  }
 0x308   :  { %266 = dma.vmem_to_hbm [thread:$0]  %s261_s3, 256, %s570_s5, [#allocation3], %s421_s19, %s421_s19, %s422_s20  }
 0x309   :  { %418 = dma.done.wait [#allocation3], 256  }
 0x30a   :  { %419 = vsyncadd [#allocation3], 4294967040 }
 0x30b   :  { %270 = vsyncpa [#allocation3], 1 }

// kernel: tpu_custom_call.1
= control target key start
LH: loop header
LB: loop body
LE: loop exit
PB: predicated region body
PF: predicated region fallthrough
CT: control target
= control target key end

     0   :  { %vm23_vm0 = vcmask 261120   ;;  %s565_s0 = inlined_call_operand.vmem [shape: f32[16,32], index: 0, kind: input, shape index: {}]   ;;  %s566_s1 = inlined_call_operand.vmem [shape: f32[32,128], index: 1, kind: input, shape index: {}]   ;;  %s567_s2 = inlined_call_operand.vmem [shape: f32[1,128], index: 2, kind: input, shape index: {}]   ;;  %s568_s3 = inlined_call_operand.vmem [shape: f32[128,32], index: 3, kind: input, shape index: {}]   ;;  %s569_s4 = inlined_call_operand.vmem [shape: f32[1,32], index: 4, kind: input, shape index: {}]   ;;  %s570_s5 = inlined_call_operand.hbm [shape: f32[16,32], index: 5, kind: output, shape index: {}]  }
   0x1   :  { %v456_v0 = vld [vmem:[%s565_s0] sm:$0xff]  ;;  %v461_v1 = vld [vmem:[%s565_s0 + $0x8] sm:$0xff] }
   0x2   :  { %10 = vsyncpa [#allocation3], 0  ;;  %v24_v2 = vsel %vm23_vm0, %v456_v0, 0.0  ;;  %v27_v3 = vsel %vm23_vm0, %v461_v1, 0.0  ;;  %v51_v14 = vld [vmem:[%s566_s1] sm:$0xff]  ;;  %v52_v15 = vld [vmem:[%s566_s1 + $0x8] sm:$0xff] }
   0x3   :  { %25 = vadd.xlane.f32.xlu0 %v24_v2  ;;  %v53_v16 = vld [vmem:[%s566_s1 + $0x10] sm:$0xff]  ;;  %v345_v17 = vpack.c.bf16 %v52_v15, %v51_v14  ;;  %v54_v18 = vld [vmem:[%s566_s1 + $0x18] sm:$0xff]  ;;  %v145_v20 = vld [vmem:[%s568_s3] sm:$0xff] }
   0x4   :  { %v349_v19 = vpack.c.bf16 %v54_v18, %v53_v16  ;;  %v146_v21 = vld [vmem:[%s568_s3 + $0x8] sm:$0xff]  ;;  %v147_v22 = vld [vmem:[%s568_s3 + $0x10] sm:$0xff]  ;;  %v148_v24 = vld [vmem:[%s568_s3 + $0x18] sm:$0xff] }
   0x5   :  { %346 = vmatprep.subr.bf16.mxu0 %v345_v17  ;;  %v353_v23 = vpack.c.bf16 %v146_v21, %v145_v20  ;;  %v357_v25 = vpack.c.bf16 %v148_v24, %v147_v22  ;;  %v149_v26 = vld [vmem:[%s568_s3 + $0x20] sm:$0xff]  ;;  %v150_v27 = vld [vmem:[%s568_s3 + $0x28] sm:$0xff]  ;;  %v151_v29 = vld [vmem:[%s568_s3 + $0x30] sm:$0xff] }
   0x6   :  { %348 = vmatpush3.bf16.msra.mxu0 %v345_v17  ;;  %v361_v28 = vpack.c.bf16 %v150_v27, %v149_v26  ;;  %v152_v30 = vld [vmem:[%s568_s3 + $0x38] sm:$0xff]  ;;  %v153_v32 = vld [vmem:[%s568_s3 + $0x40] sm:$0xff]  ;;  %v154_v33 = vld [vmem:[%s568_s3 + $0x48] sm:$0xff] }
   0x7   :  { %28 = vadd.xlane.f32.xlu0 %v27_v3  ;;  %350 = vmatprep.subr.bf16.mxu0 %v349_v19  ;;  %v365_v31 = vpack.c.bf16 %v152_v30, %v151_v29  ;;  %v369_v34 = vpack.c.bf16 %v154_v33, %v153_v32  ;;  %v155_v35 = vld [vmem:[%s568_s3 + $0x50] sm:$0xff]  ;;  %v156_v36 = vld [vmem:[%s568_s3 + $0x58] sm:$0xff]  ;;  %v157_v38 = vld [vmem:[%s568_s3 + $0x60] sm:$0xff] }
   0x8   :  { %354 = vmatprep.subr.bf16.mxu1 %v353_v23  ;;  %v373_v37 = vpack.c.bf16 %v156_v36, %v155_v35  ;;  %v158_v39 = vld [vmem:[%s568_s3 + $0x68] sm:$0xff]  ;;  %v159_v51 = vld [vmem:[%s568_s3 + $0x70] sm:$0xff]  ;;  %v160_v52 = vld [vmem:[%s568_s3 + $0x78] sm:$0xff] }
   0x9   :  { %356 = vmatpush3.bf16.msra.mxu1 %v353_v23  ;;  %v377_v40 = vpack.c.bf16 %v158_v39, %v157_v38  ;;  %v381_v53 = vpack.c.bf16 %v160_v52, %v159_v51  ;;  %v271_v54 = vld [vmem:[%s567_s2] ss:$0 sm:$0xff]  ;;  %s420_s2 = smov [#allocation2]  }
   0xa   :  { %352 = vmatpush3.bf16.msra.mxu0 %v349_v19  ;;  %358 = vmatprep.subr.bf16.mxu1 %v357_v25  ;;  %v274_v61 = vld [vmem:[%s569_s4] ss:$0 sm:$0xff]  ;;  %s260_s3 = sshll.u32 %s420_s2, 4  ;;  %s261_s3 = int_to_ptr.vmem [resolvable:$true] %s260_s3 }
   0xb   :  { %s396_s4 = scalar_lea.vmem %s261_s3, 256  ;;  %p401_p1 = scmp.lt.s32.totalorder %s261_s3, %s261_s3 }
   0xc   :  { %p397_p0 = scmp.ne.s32.totalorder %s261_s3, %s396_s4  ;;  %p402_p2 = scmp.lt.s32.totalorder %s396_s4, %s396_s4 }
   0xd   :  { %360 = vmatpush3.bf16.msra.mxu1 %v357_v25 }
   0xe   :  { %362 = vmatprep.subr.bf16.mxu1 %v361_v28  ;;  %p403_p3 = por %p402_p2, %p401_p1 }
  0x10   :  { %p404_p4 = pnand %p403_p3, %p397_p0 }
  0x11   :  { %364 = vmatpush3.bf16.msra.mxu1 %v361_v28 }
  0x12   :  { %366 = vmatprep.subr.bf16.mxu1 %v365_v31 }
  0x15   :  { %368 = vmatpush3.bf16.msra.mxu1 %v365_v31 }
  0x16   :  { %370 = vmatprep.subr.bf16.mxu1 %v369_v34 }
  0x19   :  { %372 = vmatpush3.bf16.msra.mxu1 %v369_v34 }
  0x1a   :  { %374 = vmatprep.subr.bf16.mxu1 %v373_v37 }
  0x1d   :  { %376 = vmatpush3.bf16.msra.mxu1 %v373_v37 }
  0x1e   :  { %378 = vmatprep.subr.bf16.mxu1 %v377_v40 }
  0x21   :  { %380 = vmatpush3.bf16.msra.mxu1 %v377_v40 }
  0x22   :  { %382 = vmatprep.subr.bf16.mxu1 %v381_v53 }
  0x25   :  { %384 = vmatpush3.bf16.msra.mxu1 %v381_v53 }
  0x90   :  { %v26_v4 = vpop.xlane.xlu0 %25 }
  0x91   :  { %v31_v5 = vmul.f32 0.03125, %v26_v4 }
  0x93   :  { %v468_v6 = vsub.f32 %v456_v0, %v31_v5 }
  0x94   :  { %v29_v7 = vpop.xlane.xlu0 %28 }
  0x95   :  { %v32_v8 = vmul.f32 0.03125, %v29_v7  ;;  %v35_v9 = vmul.f32 %v468_v6, %v468_v6 }
  0x97   :  { %v473_v10 = vsub.f32 %v461_v1, %v32_v8  ;;  %v37_v11 = vsel %vm23_vm0, %v35_v9, 0.0 }
  0x98   :  { %38 = vadd.xlane.f32.xlu1 %v37_v11 }
  0x99   :  { %v36_v12 = vmul.f32 %v473_v10, %v473_v10 }
  0x9b   :  { %v40_v13 = vsel %vm23_vm0, %v36_v12, 0.0 }
  0x9c   :  { %41 = vadd.xlane.f32.xlu1 %v40_v13 }
 0x125   :  { %v39_v41 = vpop.xlane.xlu1 %38 }
 0x126   :  { %v43_v42 = vmul.f32 0.03125, %v39_v41 }
 0x128   :  { %v45_v43 = vadd.f32 1e-05, %v43_v42 }
 0x129   :  { %v42_v44 = vpop.xlane.xlu1 %41 }
 0x12a   :  { %388 = vrsqrt.f32 %v45_v43  ;;  %v44_v45 = vmul.f32 0.03125, %v42_v44 }
 0x12c   :  { %v46_v46 = vadd.f32 1e-05, %v44_v45 }
 0x12e   :  { %390 = vrsqrt.f32 %v46_v46 }
 0x134   :  { %v389_v47 = vpop.eup %388 }
 0x135   :  { %v49_v48 = vmul.f32 %v389_v47, %v468_v6 }
 0x137   :  { %307 = vmatprep.mubr.msk.f32.mxu0 %vm23_vm0, %v49_v48 }
 0x138   :  { %v391_v49 = vpop.eup %390 }
 0x139   :  { %v50_v50 = vmul.f32 %v391_v49, %v473_v10 }
 0x13b   :  { %308 = vmatmul.mubr.msk.f32.vlgmr.msra.gmra.mrb[0].mxu0 %vm23_vm0, %v50_v50 }
 0x20e   :  { %v309_v55 = vpop.f32.mrb[0].mxu0 }
 0x20f   :  { %v140_v56 = vadd.f32 %v309_v55, %v271_v54  ;;  %v134_v57 = vpop.f32.mrb[1].mxu0 }
 0x210   :  { %v135_v58 = vadd.f32 %v271_v54, %v134_v57 }
 0x211   :  { %v144_v60 = vmax.f32 %v140_v56, 0.0 }
 0x212   :  { %v143_v59 = vmax.f32 %v135_v58, 0.0 }
 0x214   :  { %342 = vmatprep.mubr.f32.mxu1 %v143_v59 }
 0x215   :  { %343 = vmatmul.mubr.f32.vlgmr.msra.gmra.mrb[0].mxu1 %v144_v60 }
 0x2e8   :  { %v344_v62 = vpop.f32.mrb[0].mxu1 }
 0x2e9   :  { %v240_v63 = vadd.f32 %v344_v62, %v274_v61  ;;  %v234_v2 = vpop.f32.mrb[1].mxu1 }
 0x2ea   :  { %v235_v3 = vadd.f32 %v274_v61, %v234_v2 }
 0x2eb   :  { %v244_v4 = vmul.f32 0.5, %v240_v63 }
 0x2ec   :  { %v243_v5 = vmul.f32 0.5, %v235_v3 }
 0x2ed   :  { %392 = vtanh.f32 %v244_v4 }
 0x2ee   :  { %394 = vtanh.f32 %v243_v5 }
 0x2f7   :  { %v393_v6 = vpop.eup %392 }
 0x2f8   :  { %v395_v7 = vpop.eup %394  ;;  %v248_v8 = vmul.f32 0.5, %v393_v6 }
 0x2f9   :  { %v247_v9 = vmul.f32 0.5, %v395_v7 }
 0x2fa   :  { %v250_v10 = vadd.f32 0.5, %v248_v8 }
 0x2fb   :  { %v249_v11 = vadd.f32 0.5, %v247_v9 }
 0x2fc   :  { %v252_v12 = vadd.f32 %v250_v10, %v461_v1 }
 0x2fd   :  { %v251_v13 = vadd.f32 %v249_v11, %v456_v0 }
 0x2fe   :  { %254 = vst.msk [vmem:[#allocation2 + $0x8] sm:$0xff] %vm23_vm0, %v252_v12 }
 0x2ff   :  { %253 = vst.msk [vmem:[#allocation2] sm:$0xff] %vm23_vm0, %v251_v13 }
 0x300   :  { %407 = shalt.err (!%p404_p4)
}
 0x301   :  { %s408_s14 = scalar_lea.hbm %s570_s5, 256 }
 0x302   :  { %p409_p5 = scmp.ne.s32.totalorder %s570_s5, %s408_s14  ;;  %p412_p6 = scmp.lt.u32.totalorder %s408_s14, %s570_s5 }
 0x304   :  { %p414_p7 = pnand %p412_p6, %p409_p5 }
 0x306   :  { %417 = shalt.err (!%p414_p7)
}
 0x307   :  { %s421_s19 = smov 128   ;;  %s422_s20 = smov 8  }
 0x308   :  { %266 = dma.vmem_to_hbm [thread:$0]  %s261_s3, 256, %s570_s5, [#allocation3], %s421_s19, %s421_s19, %s422_s20  }
 0x309   :  { %418 = dma.done.wait [#allocation3], 256  }
 0x30a   :  { %419 = vsyncadd [#allocation3], 4294967040 }
 0x30b   :  { %270 = vsyncpa [#allocation3], 1 }

</bundles_post_ra>
